<compile_context>
chip_gen: v7x
topology: tpu7x:2x2x1
jax: 0.10.0
libtpu: 0.0.40
codegen_flags: <defaults>
</compile_context>

<pallas_src>
import functools

import jax
import jax.numpy as jnp
from jax.experimental import pallas as pl
from jax.experimental.pallas import tpu as pltpu


def _round_up(x, m):
    return (x + m - 1) // m * m


def _pick_ti(I, ti_request):
    """Largest lane-aligned (multiple of 128) divisor of I that is <= ti_request,
    falling back to the whole intermediate dim."""
    if ti_request >= I:
        return I
    t = (ti_request // 128) * 128
    while t >= 128:
        if I % t == 0:
            return t
        t -= 128
    return I


def _vmem_limit_bytes():
    try:
        cap = int(pltpu.get_tpu_info().vmem_capacity_bytes)
    except Exception:
        cap = 64 * 1024 * 1024  # conservative fallback (v7x per-TC VMEM)
    return (cap * 3) // 4       # leave headroom for the compiler


def prepare_weights(w1w3, w2, *, ti_request=512):
    """One-time weight repack (keep OUT of the per-token-call hot path).

    w1w3: [2*I, H] torch nn.Linear layout (gate rows first, up rows second).
    w2  : [H, I]   torch nn.Linear layout.

    Returns:
      w13_t: [H, 2*I]  column block k (width 2*ti) = [W1_k^T | W3_k^T]
      w2_t : [I, H]    row block k = W2_k^T
      ti   : chosen intermediate tile size (static)
    """
    two_I, H = w1w3.shape
    I = two_I // 2
    ti = _pick_ti(I, ti_request)
    nk = I // ti

    w1 = w1w3[:I].reshape(nk, ti, H)
    w3 = w1w3[I:].reshape(nk, ti, H)
    w13 = jnp.concatenate([w1, w3], axis=1)                         # [nk, 2*ti, H]
    w13_t = jnp.transpose(w13, (2, 0, 1)).reshape(H, nk * 2 * ti)   # [H, 2*I]
    w2_t = jnp.transpose(w2, (1, 0))                                # [I, H]
    return w13_t, w2_t, ti


def _mlp_kernel(x_ref, w13_ref, w2_ref, o_ref, acc_ref, *, ti):
    # x_ref  : [tm, H]      token tile (native dtype), resident across k
    # w13_ref: [H, 2*ti]    [W1_k^T | W3_k^T]
    # w2_ref : [ti, H]      W2_k^T
    # o_ref  : [tm, H]
    # acc_ref: [tm, H] f32  accumulator over the intermediate (k) axis
    k = pl.program_id(1)

    @pl.when(k == 0)
    def _init():
        acc_ref[...] = jnp.zeros_like(acc_ref)

    x = x_ref[...]                                                     # native dtype to MXU
    p = jnp.dot(x, w13_ref[...], preferred_element_type=jnp.float32)   # [tm, 2*ti] f32 acc
    a1 = p[:, :ti]
    a3 = p[:, ti:]
    h = (a1 * jax.nn.sigmoid(a1)) * a3                                 # SwiGLU in f32
    h = h.astype(x_ref.dtype)                                          # back to MXU dtype
    acc_ref[...] += jnp.dot(h, w2_ref[...], preferred_element_type=jnp.float32)

    @pl.when(k == pl.num_programs(1) - 1)
    def _finalize():
        o_ref[...] = acc_ref[...].astype(o_ref.dtype)


@functools.partial(jax.jit, static_argnames=("ti", "tm"))
def llama_mlp_tpsp(x, w13_t, w2_t, *, ti, tm=256):
    """x: [B, S, H]; w13_t / w2_t / ti produced by prepare_weights()."""
    B, S, H = x.shape
    I = w2_t.shape[0]
    assert w13_t.shape == (H, 2 * I)
    assert I % ti == 0
    nk = I // ti

    M = B * S
    x2d = x.reshape(M, H)

    # Token tile: MXU-friendly, padded so the grid divides evenly.
    tm_eff = min(tm, _round_up(M, 8))
    M_pad = _round_up(M, tm_eff)
    if M_pad != M:
        x2d = jnp.pad(x2d, ((0, M_pad - M), (0, 0)))

    kernel = functools.partial(_mlp_kernel, ti=ti)

    out2d = pl.pallas_call(
        kernel,
        out_shape=jax.ShapeDtypeStruct((M_pad, H), x.dtype),
        grid_spec=pltpu.PrefetchScalarGridSpec(
            num_scalar_prefetch=0,
            grid=(M_pad // tm_eff, nk),                # reduction (I) axis last
            in_specs=[
                pl.BlockSpec((tm_eff, H), lambda i, k: (i, 0)),   # x tile, resident over k
                pl.BlockSpec((H, 2 * ti), lambda i, k: (0, k)),   # [W1_k^T | W3_k^T]
                pl.BlockSpec((ti, H), lambda i, k: (k, 0)),       # W2_k^T
            ],
            out_specs=pl.BlockSpec((tm_eff, H), lambda i, k: (i, 0)),
            scratch_shapes=[pltpu.VMEM((tm_eff, H), jnp.float32)],
        ),
        compiler_params=pltpu.CompilerParams(
            dimension_semantics=("parallel", "arbitrary"),
            vmem_limit_bytes=_vmem_limit_bytes(),
        ),
    )(x2d, w13_t, w2_t)

    if M_pad != M:
        out2d = out2d[:M]
    return out2d.reshape(B, S, H)


def _reference(x, w1w3, w2):
    I = w1w3.shape[0] // 2
    xf = x.astype(jnp.float32)
    packed = jnp.einsum("bsh,oh->bso", xf, w1w3.astype(jnp.float32))
    a1, a3 = packed[..., :I], packed[..., I:]
    h = (a1 * jax.nn.sigmoid(a1)) * a3
    return jnp.einsum("bsi,hi->bsh", h, w2.astype(jnp.float32)).astype(x.dtype)


def _run_case(key, B, S, H, I, *, tm, ti_request, atol, rtol):
    kx, k13, k2 = jax.random.split(key, 3)
    x = jax.random.normal(kx, (B, S, H), dtype=jnp.float32)
    # Torch nn.Linear weight layout: [out_features, in_features], bias=False.
    w1w3 = jax.random.normal(k13, (2 * I, H), dtype=jnp.float32) * 0.05
    w2 = jax.random.normal(k2, (H, I), dtype=jnp.float32) * 0.05

    w13_t, w2_t, ti = prepare_weights(w1w3, w2, ti_request=ti_request)
    y = llama_mlp_tpsp(x, w13_t, w2_t, ti=ti, tm=tm)
    y = jax.block_until_ready(y)

    y_ref = _reference(x, w1w3, w2)
    assert y.shape == (B, S, H)
    assert jnp.allclose(y, y_ref, atol=atol, rtol=rtol), (
        f"mismatch vs reference (B={B},S={S},H={H},I={I})")


if __name__ == "__main__":
    key = jax.random.PRNGKey(0)
    k0, k1 = jax.random.split(key)

    # Small config: batch=2, seq=8, hidden_size=32, intermediate_size=64.
    _run_case(k0, B=2, S=8, H=32, I=64, tm=256, ti_request=512, atol=1e-4, rtol=1e-4)

    # Slightly larger config exercising multiple token tiles and the
    # intermediate-axis accumulation path (grid = (2, 2)).
    _run_case(k1, B=2, S=128, H=256, I=512, tm=128, ti_request=256, atol=1e-4, rtol=1e-4)

    print("KERNEL_OK")
</pallas_src>

<mosaic_0001>
module attributes {stable_mosaic.version = 11 : i64} {
  func.func @_mlp_kernel(%arg0: i32, %arg1: i32, %arg2: memref<16x32xf32, #tpu.memory_space<vmem>>, %arg3: memref<32x128xf32, #tpu.memory_space<vmem>>, %arg4: memref<64x32xf32, #tpu.memory_space<vmem>>, %arg5: memref<16x32xf32, #tpu.memory_space<vmem>>, %arg6: memref<16x32xf32, #tpu.memory_space<vmem>>) attributes {dimension_semantics = [#tpu.dimension_semantics<parallel>, #tpu.dimension_semantics<arbitrary>], iteration_bounds = array<i64: 1, 1>, scalar_prefetch = 0 : i64, scratch_operands = 1 : i64, tpu.core_type = #tpu.core_type<tc>, window_params = [{transform_indices = @transform_0, window_bounds = array<i64: 16, 32>}, {transform_indices = @transform_1, window_bounds = array<i64: 32, 128>}, {transform_indices = @transform_2, window_bounds = array<i64: 64, 32>}, {transform_indices = @transform_3, window_bounds = array<i64: 16, 32>}]} {
    %c0_i32 = arith.constant 0 : i32
    %0 = arith.cmpi eq, %arg1, %c0_i32 : i32
    %1 = arith.extui %0 : i1 to i32
    %c0_i32_0 = arith.constant 0 : i32
    %2 = arith.cmpi ne, %1, %c0_i32_0 : i32
    scf.if %2 {
      %cst_14 = arith.constant 0.000000e+00 : f32
      %23 = vector.broadcast %cst_14 : f32 to vector<16x32xf32>
      %c0_15 = arith.constant 0 : index
      %c0_16 = arith.constant 0 : index
      %24 = vector.load %arg6[%c0_15, %c0_16] : memref<16x32xf32, #tpu.memory_space<vmem>>, vector<16x32xf32>
      tpu.vector_store %arg6[%c0_15, %c0_16], %23 {strides = array<i32>} : memref<16x32xf32, #tpu.memory_space<vmem>>, vector<16x32xf32>,
    } else {
    }
    %c0 = arith.constant 0 : index
    %c0_1 = arith.constant 0 : index
    %3 = vector.load %arg2[%c0, %c0_1] : memref<16x32xf32, #tpu.memory_space<vmem>>, vector<16x32xf32>
    %c0_2 = arith.constant 0 : index
    %c0_3 = arith.constant 0 : index
    %4 = vector.load %arg3[%c0_2, %c0_3] : memref<32x128xf32, #tpu.memory_space<vmem>>, vector<32x128xf32>
    %cst = arith.constant dense<0.000000e+00> : vector<16x128xf32>
    %5 = tpu.matmul %3, %4, %cst {dimension_numbers = #tpu.dot_dimension_numbers<[1], [0], [0], [1], [0, 0, 1, 1], [], []>} : vector<16x32xf32>, vector<32x128xf32>, vector<16x128xf32> -> vector<16x128xf32>
    %6 = vector.extract_strided_slice %5 {offsets = [0, 0], sizes = [16, 64], strides = [1, 1]} : vector<16x128xf32> to vector<16x64xf32>
    %7 = vector.extract_strided_slice %5 {offsets = [0, 64], sizes = [16, 64], strides = [1, 1]} : vector<16x128xf32> to vector<16x64xf32>
    %8 = arith.negf %6 : vector<16x64xf32>
    %9 = math.exp %8 : vector<16x64xf32>
    %cst_4 = arith.constant 1.000000e+00 : f32
    %10 = vector.broadcast %cst_4 : f32 to vector<16x64xf32>
    %11 = arith.addf %10, %9 : vector<16x64xf32>
    %12 = arith.divf %10, %11 : vector<16x64xf32>
    %13 = arith.mulf %6, %12 : vector<16x64xf32>
    %14 = arith.mulf %13, %7 : vector<16x64xf32>
    %c0_5 = arith.constant 0 : index
    %c0_6 = arith.constant 0 : index
    %15 = vector.load %arg6[%c0_5, %c0_6] : memref<16x32xf32, #tpu.memory_space<vmem>>, vector<16x32xf32>
    %c0_7 = arith.constant 0 : index
    %c0_8 = arith.constant 0 : index
    %16 = vector.load %arg4[%c0_7, %c0_8] : memref<64x32xf32, #tpu.memory_space<vmem>>, vector<64x32xf32>
    %cst_9 = arith.constant dense<0.000000e+00> : vector<16x32xf32>
    %17 = tpu.matmul %14, %16, %cst_9 {dimension_numbers = #tpu.dot_dimension_numbers<[1], [0], [0], [1], [0, 0, 1, 1], [], []>} : vector<16x64xf32>, vector<64x32xf32>, vector<16x32xf32> -> vector<16x32xf32>
    %18 = arith.addf %15, %17 : vector<16x32xf32>
    %c0_10 = arith.constant 0 : index
    %c0_11 = arith.constant 0 : index
    %19 = vector.load %arg6[%c0_10, %c0_11] : memref<16x32xf32, #tpu.memory_space<vmem>>, vector<16x32xf32>
    tpu.vector_store %arg6[%c0_10, %c0_11], %18 {strides = array<i32>} : memref<16x32xf32, #tpu.memory_space<vmem>>, vector<16x32xf32>,
    %c0_i32_12 = arith.constant 0 : i32
    %20 = arith.cmpi eq, %arg1, %c0_i32_12 : i32
    %21 = arith.extui %20 : i1 to i32
    %c0_i32_13 = arith.constant 0 : i32
    %22 = arith.cmpi ne, %21, %c0_i32_13 : i32
    scf.if %22 {
      %c0_14 = arith.constant 0 : index
      %c0_15 = arith.constant 0 : index
      %23 = vector.load %arg6[%c0_14, %c0_15] : memref<16x32xf32, #tpu.memory_space<vmem>>, vector<16x32xf32>
      %c0_16 = arith.constant 0 : index
      %c0_17 = arith.constant 0 : index
      %24 = vector.load %arg5[%c0_16, %c0_17] : memref<16x32xf32, #tpu.memory_space<vmem>>, vector<16x32xf32>
      tpu.vector_store %arg5[%c0_16, %c0_17], %23 {strides = array<i32>} : memref<16x32xf32, #tpu.memory_space<vmem>>, vector<16x32xf32>,
    } else {
    }
    return
  }
  func.func @transform_0(%arg0: i32, %arg1: i32) -> (i32, i32) {
    %c0_i32 = arith.constant 0 : i32
    %c0_i32_0 = arith.constant 0 : i32
    return %arg0, %c0_i32 : i32, i32
  }
  func.func @transform_1(%arg0: i32, %arg1: i32) -> (i32, i32) {
    %c0_i32 = arith.constant 0 : i32
    %c0_i32_0 = arith.constant 0 : i32
    return %c0_i32, %arg1 : i32, i32
  }
  func.func @transform_2(%arg0: i32, %arg1: i32) -> (i32, i32) {
    %c0_i32 = arith.constant 0 : i32
    %c0_i32_0 = arith.constant 0 : i32
    return %arg1, %c0_i32 : i32, i32
  }
  func.func @transform_3(%arg0: i32, %arg1: i32) -> (i32, i32) {
    %c0_i32 = arith.constant 0 : i32
    %c0_i32_0 = arith.constant 0 : i32
    return %arg0, %c0_i32 : i32, i32
  }
}

</mosaic_0001>

<bundles_post_ra>
// kernel: llama_mlp_tpsp.1
= control target key start
LH: loop header
LB: loop body
LE: loop exit
PB: predicated region body
PF: predicated region fallthrough
CT: control target
= control target key end

     0   :  { %vm19_vm0 = vcmask 261120   ;;  %s453_s0 = inlined_call_operand.vmem [shape: f32[16,32], index: 0, kind: input, shape index: {}]   ;;  %s454_s1 = inlined_call_operand.vmem [shape: f32[32,128], index: 1, kind: input, shape index: {}]   ;;  %s455_s2 = inlined_call_operand.vmem [shape: f32[64,32], index: 2, kind: input, shape index: {}]   ;;  %s456_s3 = inlined_call_operand.hbm [shape: f32[16,32], index: 3, kind: output, shape index: {}]  }
   0x1   :  { %v24_v0 = vld [vmem:[%s454_s1] sm:$0xff]  ;;  %v25_v1 = vld [vmem:[%s454_s1 + $0x8] sm:$0xff]  ;;  %v26_v2 = vld [vmem:[%s454_s1 + $0x10] sm:$0xff] }
   0x2   :  { %v305_v3 = vpack.c.bf16 %v25_v1, %v24_v0  ;;  %v27_v4 = vld [vmem:[%s454_s1 + $0x18] sm:$0xff]  ;;  %v22_v5 = vld [vmem:[%s453_s0] sm:$0xff] }
   0x3   :  { %v309_v6 = vpack.c.bf16 %v27_v4, %v26_v2  ;;  %283 = vmatprep.mubr.msk.f32.mxu0 %vm19_vm0, %v22_v5 }
   0x4   :  { %8 = vsyncpa [#allocation4], 0  ;;  %306 = vmatprep.subr.bf16.mxu0 %v305_v3  ;;  %v23_v7 = vld [vmem:[%s453_s0 + $0x8] sm:$0xff]  ;;  %v136_v8 = vld [vmem:[%s455_s2] sm:$0xff]  ;;  %v366_v20 = vmov 0.0   ;;  %s367_s11 = smov 64  }
   0x5   :  { %308 = vmatpush3.bf16.msra.mxu0 %v305_v3  ;;  %v137_v9 = vld [vmem:[%s455_s2 + $0x8] sm:$0xff]  ;;  %v138_v10 = vld [vmem:[%s455_s2 + $0x10] sm:$0xff]  ;;  %v139_v12 = vld [vmem:[%s455_s2 + $0x18] sm:$0xff]  ;;  %21 = vst.msk [vmem:[#allocation2 + $0x8] sm:$0xff] %vm19_vm0, %v366_v20  ;;  %vm144_vm1 = vcmask 523264  }
   0x6   :  { %310 = vmatprep.subr.bf16.mxu0 %v309_v6  ;;  %v313_v11 = vpack.c.bf16 %v137_v9, %v136_v8  ;;  %v317_v13 = vpack.c.bf16 %v139_v12, %v138_v10  ;;  %v140_v14 = vld [vmem:[%s455_s2 + $0x20] sm:$0xff]  ;;  %v141_v15 = vld [vmem:[%s455_s2 + $0x28] sm:$0xff]  ;;  %v142_v17 = vld [vmem:[%s455_s2 + $0x30] sm:$0xff]  ;;  %20 = vst.msk [vmem:[#allocation2] sm:$0xff] %vm19_vm0, %v366_v20 }
   0x7   :  { %v321_v16 = vpack.c.bf16 %v141_v15, %v140_v14  ;;  %v143_v18 = vld [vmem:[%s455_s2 + $0x38] sm:$0xff]  ;;  %s368_s2 = smov [#allocation3]  }
   0x8   :  { %314 = vmatprep.subr.bf16.mxu1 %v313_v11  ;;  %v325_v19 = vpack.c.bf16 %v143_v18, %v142_v17  ;;  %s242_s12 = sshll.u32 %s368_s2, 4  ;;  %s243_s12 = int_to_ptr.vmem [resolvable:$true] %s242_s12 }
   0x9   :  { %312 = vmatpush3.bf16.msra.mxu0 %v309_v6  ;;  %316 = vmatpush3.bf16.msra.mxu1 %v313_v11  ;;  %s342_s13 = scalar_lea.vmem %s243_s12, 256  ;;  %p347_p1 = scmp.lt.s32.totalorder %s243_s12, %s243_s12 }
   0xa   :  { %318 = vmatprep.subr.bf16.mxu1 %v317_v13  ;;  %p343_p0 = scmp.ne.s32.totalorder %s243_s12, %s342_s13  ;;  %p348_p2 = scmp.lt.s32.totalorder %s342_s13, %s342_s13 }
   0xc   :  { %284 = vmatmul.mubr.msk.f32.vlgmr.msra.gmra.mrb[0].mxu0 %vm19_vm0, %v23_v7  ;;  %v135_v37 = vld [vmem:[#allocation2 + $0x8] sm:$0xff]  ;;  %p349_p3 = por %p348_p2, %p347_p1 }
   0xd   :  { %320 = vmatpush3.bf16.msra.mxu1 %v317_v13  ;;  %v134_v38 = vld [vmem:[#allocation2] sm:$0xff] }
   0xe   :  { %322 = vmatprep.subr.bf16.mxu1 %v321_v16  ;;  %p350_p4 = pnand %p349_p3, %p343_p0 }
  0x11   :  { %324 = vmatpush3.bf16.msra.mxu1 %v321_v16 }
  0x12   :  { %326 = vmatprep.subr.bf16.mxu1 %v325_v19 }
  0x15   :  { %328 = vmatpush3.bf16.msra.mxu1 %v325_v19 }
  0xdf   :  { %v285_v21 = vpop.f32.mrb[0].mxu0 }
  0xe0   :  { %v101_v22 = vpop.f32.mrb[1].mxu0  ;;  %v256_v24 = vmul.f32 -1.442695, %v285_v21 }
  0xe1   :  { %126 = vrot.lane.b32.xlu0 %v101_v22, %s367_s11  ;;  %v255_v23 = vmul.f32 -1.442695, %v101_v22 }
  0xe3   :  { %334 = vpow2.f32 %v255_v23 }
  0xe4   :  { %336 = vpow2.f32 %v256_v24 }
  0xe5   :  { %128 = vrot.lane.b32.xlu0 %v285_v21, %s367_s11 }
  0xed   :  { %v335_v25 = vpop.eup %334 }
  0xee   :  { %v116_v26 = vadd.f32 1.0, %v335_v25  ;;  %v337_v27 = vpop.eup %336 }
  0xef   :  { %v117_v28 = vadd.f32 1.0, %v337_v27 }
  0xf0   :  { %338 = vrcp.f32 %v116_v26 }
  0xf1   :  { %340 = vrcp.f32 %v117_v28 }
  0xfa   :  { %v339_v29 = vpop.eup %338 }
  0xfb   :  { %v122_v30 = vmul.f32 %v339_v29, %v101_v22  ;;  %v341_v31 = vpop.eup %340 }
  0xfc   :  { %v123_v34 = vmul.f32 %v341_v31, %v285_v21 }
 0x153   :  { %v127_v32 = vpop.permute.xlu0 %126 }
 0x154   :  { %v132_v33 = vmul.f32 %v127_v32, %v122_v30 }
 0x156   :  { %302 = vmatprep.mubr.msk.f32.mxu1 %vm144_vm1, %v132_v33 }
 0x157   :  { %v129_v35 = vpop.permute.xlu0 %128 }
 0x158   :  { %v133_v36 = vmul.f32 %v129_v35, %v123_v34 }
 0x15a   :  { %303 = vmatmul.mubr.msk.f32.vlgmr.msra.gmra.mrb[0].mxu1 %vm144_vm1, %v133_v36 }
 0x22d   :  { %v304_v39 = vpop.f32.mrb[0].mxu1 }
 0x22e   :  { %v227_v40 = vadd.f32 %v304_v39, %v135_v37  ;;  %v217_v41 = vpop.f32.mrb[1].mxu1 }
 0x22f   :  { %v226_v42 = vadd.f32 %v217_v41, %v134_v38 }
 0x230   :  { %229 = vst.msk [vmem:[#allocation2 + $0x8] sm:$0xff] %vm19_vm0, %v227_v40 }
 0x231   :  { %228 = vst.msk [vmem:[#allocation2] sm:$0xff] %vm19_vm0, %v226_v42 }
 0x237   :  { %v234_v43 = vld [vmem:[#allocation2 + $0x8] sm:$0xff] }
 0x238   :  { %v233_v44 = vld [vmem:[#allocation2] sm:$0xff]  ;;  %236 = vst.msk [vmem:[#allocation3 + $0x8] sm:$0xff] %vm19_vm0, %v234_v43 }
 0x239   :  { %235 = vst.msk [vmem:[#allocation3] sm:$0xff] %vm19_vm0, %v233_v44 }
 0x23a   :  { %353 = shalt.err (!%p350_p4)
}
 0x23b   :  { %s354_s16 = scalar_lea.hbm %s456_s3, 256 }
 0x23c   :  { %p355_p5 = scmp.ne.s32.totalorder %s456_s3, %s354_s16  ;;  %p358_p6 = scmp.lt.u32.totalorder %s354_s16, %s456_s3 }
 0x23e   :  { %p360_p7 = pnand %p358_p6, %p355_p5 }
 0x240   :  { %363 = shalt.err (!%p360_p7)
}
 0x241   :  { %s369_s21 = smov 128   ;;  %s370_s22 = smov 8  }
 0x242   :  { %248 = dma.vmem_to_hbm [thread:$0]  %s243_s12, 256, %s456_s3, [#allocation4], %s369_s21, %s369_s21, %s370_s22  }
 0x243   :  { %364 = dma.done.wait [#allocation4], 256  }
 0x244   :  { %365 = vsyncadd [#allocation4], 4294967040 }
 0x245   :  { %252 = vsyncpa [#allocation4], 1 }

</bundles_post_ra>
